<compile_context>
chip_gen: v5e
topology: v5e:2x2
jax: 0.10.0
libtpu: 0.0.40
codegen_flags: <defaults>
</compile_context>

<pallas_src>
import functools
import math

import jax
import jax.numpy as jnp
from jax import lax
from jax.experimental import pallas as pl
from jax.experimental.pallas import tpu as pltpu


def _round_up(x, m):
    return (x + m - 1) // m * m


def _nc2_kernel(gmean_ref, rows_i_ref, rows_j_ref, maxcos_ref, max_sc,
                *, n_valid, tile_c, use_bf16_matmul):
    i = pl.program_id(0)
    j = pl.program_id(1)

    @pl.when((i == 0) & (j == 0))
    def _init():
        # Sentinel below any valid cosine (>= -1); final value is clamped to
        # [-0.99999, 0.99999] anyway, which also covers the degenerate C == 1
        # case exactly like the PyTorch module.
        max_sc[0] = -2.0

    # cosine is symmetric -> only upper-triangular blocks (j >= i) are needed.
    @pl.when(j >= i)
    def _compute():
        g = gmean_ref[...].astype(jnp.float32)                    # (1, D_pad)

        def normalize(block):
            # center + F.normalize(p=2, dim=1):
            #   x / max(||x||, 1e-12)  ==  x * rsqrt(max(||x||^2, 1e-24))
            # rsqrt runs on the EUP slot; the divide becomes one VPU multiply.
            x = block.astype(jnp.float32) - g
            sq = jnp.sum(x * x, axis=1, keepdims=True)
            inv = lax.rsqrt(jnp.maximum(sq, 1e-24))
            return x * inv

        ni = normalize(rows_i_ref[...])                           # (TC, D_pad)
        nj = normalize(rows_j_ref[...])                           # (TC, D_pad)

        if use_bf16_matmul:
            # bf16 operands -> full-rate MXU; accumulation stays f32.
            ni = ni.astype(jnp.bfloat16)
            nj = nj.astype(jnp.bfloat16)

        # Gram tile: contract the feature (lane) dim of both operands; this is
        # the A @ B.T form the MXU consumes without an explicit XLU transpose.
        cos = lax.dot_general(
            ni, nj,
            dimension_numbers=(((1,), (1,)), ((), ())),
            preferred_element_type=jnp.float32,
        )                                                         # (TC, TC)

        # Mask (a) padded rows/cols and (b) the diagonal to a constant instead
        # of negating the full tile ("cosine - 2*diag(diag(cosine))").
        row = i * tile_c + lax.broadcasted_iota(jnp.int32, cos.shape, 0)
        col = j * tile_c + lax.broadcasted_iota(jnp.int32, cos.shape, 1)
        invalid = (row >= n_valid) | (col >= n_valid) | (row == col)
        cos = jnp.where(invalid, -2.0, cos)

        max_sc[0] = jnp.maximum(max_sc[0], jnp.max(cos))

    @pl.when((i == pl.num_programs(0) - 1) & (j == pl.num_programs(1) - 1))
    def _finalize():
        maxcos_ref[0, 0] = jnp.clip(max_sc[0], -0.99999, 0.99999)


def nc2_loss_v1(means, *, tile_c=256, use_bf16_matmul=False):
    """Returns (loss, max_cosine) matching NC2Loss_v1.forward."""
    C, D = means.shape

    # Lane-dense padding of the feature dim; sublane/row-block padding of C.
    D_pad = _round_up(max(D, 1), 128)
    if C <= tile_c:
        TC = _round_up(max(C, 1), 8)
        C_pad = TC
    else:
        TC = tile_c
        C_pad = _round_up(C, TC)
    n_blk = C_pad // TC

    # Global class-mean over the *real* rows.  Tiny O(C*D) reduction kept in
    # the wrapper so each row block can be normalized independently in-kernel
    # (the hot O(C^2*D) gram + max stays inside the kernel).
    g_mean = jnp.mean(means.astype(jnp.float32), axis=0, keepdims=True)
    g_mean_p = jnp.zeros((1, D_pad), jnp.float32).at[:, :D].set(g_mean)

    # Zero-pad means; padded rows/cols are masked out inside the kernel.
    means_p = jnp.zeros((C_pad, D_pad), means.dtype).at[:C, :D].set(means)

    kernel = functools.partial(
        _nc2_kernel, n_valid=C, tile_c=TC, use_bf16_matmul=use_bf16_matmul)

    # Explicit VMEM budget: double-buffered input blocks + normalization
    # temporaries + the (TC, TC) gram tile.  Capped at 64 MiB (v7x physical).
    blk_bytes = TC * D_pad * 4
    vmem_est = (2 * (2 * blk_bytes + D_pad * 4)   # double-buffered inputs
                + 6 * blk_bytes                   # centered/normalized temps
                + 4 * TC * TC * 4)                # gram tile + mask temps
    vmem_limit = int(min(vmem_est + (8 << 20), 64 << 20))

    max_cos = pl.pallas_call(
        kernel,
        out_shape=jax.ShapeDtypeStruct((1, 1), jnp.float32),
        grid=(n_blk, n_blk),
        in_specs=[
            pl.BlockSpec((1, D_pad), lambda i, j: (0, 0)),     # g_mean
            pl.BlockSpec((TC, D_pad), lambda i, j: (i, 0)),    # row block i
            pl.BlockSpec((TC, D_pad), lambda i, j: (j, 0)),    # row block j
        ],
        out_specs=pl.BlockSpec((1, 1), lambda i, j: (0, 0),
                               memory_space=pltpu.SMEM),
        scratch_shapes=[pltpu.SMEM((1,), jnp.float32)],        # running max
        compiler_params=pltpu.CompilerParams(
            # Both grid axes revisit the single running-max accumulator /
            # scalar output, so they must be "arbitrary" (no megacore race).
            dimension_semantics=("arbitrary", "arbitrary"),
            vmem_limit_bytes=vmem_limit,
        ),
    )(g_mean_p, means_p, means_p)

    max_cos = max_cos[0, 0]
    # Scalar acos on the single reduced value is glue; kept outside the kernel.
    loss = -jnp.arccos(max_cos)
    return loss, max_cos


def nc2_loss_v1_ref(means):
    """Pure-JAX reference for validation."""
    m = means.astype(jnp.float32)
    g = jnp.mean(m, axis=0, keepdims=True)
    c = m - g
    n = jnp.sqrt(jnp.sum(c * c, axis=1, keepdims=True))
    mn = c / jnp.maximum(n, 1e-12)
    cos = mn @ mn.T
    cos = cos - 2.0 * jnp.diag(jnp.diag(cos))
    max_cos = jnp.clip(jnp.max(cos), -0.99999, 0.99999)
    return -jnp.arccos(max_cos), max_cos


if __name__ == "__main__":
    # `means` is a (num_classes, feature_dim) matrix of class means.
    key = jax.random.PRNGKey(0)
    C, D = 8, 32
    means = jax.random.normal(key, (C, D), dtype=jnp.float32)

    loss, max_cos = nc2_loss_v1(means)
    jax.block_until_ready((loss, max_cos))

    loss_ref, max_cos_ref = nc2_loss_v1_ref(means)
    assert jnp.allclose(max_cos, max_cos_ref, atol=1e-5, rtol=1e-5), (
        max_cos, max_cos_ref)
    assert jnp.allclose(loss, loss_ref, atol=1e-5, rtol=1e-5), (loss, loss_ref)

    # Exercise the tiled multi-block path (padding + masking + triangle skip).
    C2, D2 = 300, 200
    means2 = jax.random.normal(jax.random.PRNGKey(1), (C2, D2), jnp.float32)
    loss2, max_cos2 = nc2_loss_v1(means2, tile_c=256)
    jax.block_until_ready((loss2, max_cos2))
    loss2_ref, max_cos2_ref = nc2_loss_v1_ref(means2)
    assert jnp.allclose(max_cos2, max_cos2_ref, atol=1e-5, rtol=1e-5), (
        max_cos2, max_cos2_ref)
    assert jnp.allclose(loss2, loss2_ref, atol=1e-4, rtol=1e-4), (
        loss2, loss2_ref)

    # bf16 MXU path (full-rate matmul), gated behind a looser accuracy check
    # since bf16 operands perturb max_cosine by O(1e-3).
    loss3, max_cos3 = nc2_loss_v1(means2, tile_c=256, use_bf16_matmul=True)
    jax.block_until_ready((loss3, max_cos3))
    assert jnp.allclose(max_cos3, max_cos2_ref, atol=5e-3, rtol=5e-3), (
        max_cos3, max_cos2_ref)

    # min_angle (degrees) is computed but not returned by the PyTorch module:
    _min_angle = math.degrees(float(jnp.arccos(max_cos)))

    print("KERNEL_OK")
</pallas_src>

<mosaic_0001>
module attributes {stable_mosaic.version = 11 : i64} {
  func.func @_nc2_kernel(%arg0: i32, %arg1: i32, %arg2: memref<1x128xf32, #tpu.memory_space<vmem>>, %arg3: memref<8x128xf32, #tpu.memory_space<vmem>>, %arg4: memref<8x128xf32, #tpu.memory_space<vmem>>, %arg5: memref<1x1xf32, #tpu.memory_space<smem>>, %arg6: memref<1xf32, #tpu.memory_space<smem>>) attributes {dimension_semantics = [#tpu.dimension_semantics<arbitrary>, #tpu.dimension_semantics<arbitrary>], iteration_bounds = array<i64: 1, 1>, scalar_prefetch = 0 : i64, scratch_operands = 1 : i64, tpu.core_type = #tpu.core_type<tc>, window_params = [{pipeline_mode = #tpu.pipeline_mode<synchronous>, transform_indices = @transform_0, window_bounds = array<i64: 1, 128>}, {transform_indices = @transform_1, window_bounds = array<i64: 8, 128>}, {transform_indices = @transform_2, window_bounds = array<i64: 8, 128>}, {transform_indices = @transform_3, window_bounds = array<i64: 1, 1>}]} {
    %c0_i32 = arith.constant 0 : i32
    %0 = arith.cmpi eq, %arg0, %c0_i32 : i32
    %c0_i32_0 = arith.constant 0 : i32
    %1 = arith.cmpi eq, %arg1, %c0_i32_0 : i32
    %2 = arith.andi %0, %1 : i1
    %3 = arith.extui %2 : i1 to i32
    %c0_i32_1 = arith.constant 0 : i32
    %4 = arith.cmpi ne, %3, %c0_i32_1 : i32
    scf.if %4 {
      %cst = arith.constant -2.000000e+00 : f32
      %c0 = arith.constant 0 : index
      %13 = memref.load %arg6[%c0] : memref<1xf32, #tpu.memory_space<smem>>
      memref.store %cst, %arg6[%c0] : memref<1xf32, #tpu.memory_space<smem>>
    } else {
    }
    %5 = arith.cmpi sge, %arg1, %arg0 : i32
    %6 = arith.extui %5 : i1 to i32
    %c0_i32_2 = arith.constant 0 : i32
    %7 = arith.cmpi ne, %6, %c0_i32_2 : i32
    scf.if %7 {
      %c0 = arith.constant 0 : index
      %c0_6 = arith.constant 0 : index
      %13 = vector.load %arg2[%c0, %c0_6] : memref<1x128xf32, #tpu.memory_space<vmem>>, vector<1x128xf32>
      %c0_7 = arith.constant 0 : index
      %c0_8 = arith.constant 0 : index
      %14 = vector.load %arg3[%c0_7, %c0_8] : memref<8x128xf32, #tpu.memory_space<vmem>>, vector<8x128xf32>
      %15 = vector.broadcast %13 : vector<1x128xf32> to vector<8x128xf32>
      %16 = arith.subf %14, %15 : vector<8x128xf32>
      %17 = arith.mulf %16, %16 : vector<8x128xf32>
      %cst = arith.constant dense<0.000000e+00> : vector<8xf32>
      %18 = vector.multi_reduction <add>, %17, %cst [1] : vector<8x128xf32> to vector<8xf32>
      %19 = vector.shape_cast %18 : vector<8xf32> to vector<8x1xf32>
      %cst_9 = arith.constant 1.000000e-24 : f32
      %20 = vector.broadcast %cst_9 : f32 to vector<8x1xf32>
      %21 = arith.maximumf %19, %20 : vector<8x1xf32>
      %22 = math.rsqrt %21 : vector<8x1xf32>
      %23 = vector.broadcast %22 : vector<8x1xf32> to vector<8x128xf32>
      %24 = arith.mulf %16, %23 : vector<8x128xf32>
      %c0_10 = arith.constant 0 : index
      %c0_11 = arith.constant 0 : index
      %25 = vector.load %arg4[%c0_10, %c0_11] : memref<8x128xf32, #tpu.memory_space<vmem>>, vector<8x128xf32>
      %26 = vector.broadcast %13 : vector<1x128xf32> to vector<8x128xf32>
      %27 = arith.subf %25, %26 : vector<8x128xf32>
      %28 = arith.mulf %27, %27 : vector<8x128xf32>
      %cst_12 = arith.constant dense<0.000000e+00> : vector<8xf32>
      %29 = vector.multi_reduction <add>, %28, %cst_12 [1] : vector<8x128xf32> to vector<8xf32>
      %30 = vector.shape_cast %29 : vector<8xf32> to vector<8x1xf32>
      %cst_13 = arith.constant 1.000000e-24 : f32
      %31 = vector.broadcast %cst_13 : f32 to vector<8x1xf32>
      %32 = arith.maximumf %30, %31 : vector<8x1xf32>
      %33 = math.rsqrt %32 : vector<8x1xf32>
      %34 = vector.broadcast %33 : vector<8x1xf32> to vector<8x128xf32>
      %35 = arith.mulf %27, %34 : vector<8x128xf32>
      %cst_14 = arith.constant dense<0.000000e+00> : vector<8x8xf32>
      %36 = tpu.matmul %24, %35, %cst_14 {dimension_numbers = #tpu.dot_dimension_numbers<[1], [1], [0], [0], [0, 0, 1, 0], [], []>} : vector<8x128xf32>, vector<8x128xf32>, vector<8x8xf32> -> vector<8x8xf32>
      %c8_i32 = arith.constant 8 : i32
      %37 = arith.muli %arg0, %c8_i32 : i32
      %38 = tpu.iota {dimensions = array<i32: 0>} : vector<8x8xi32>
      %39 = vector.broadcast %37 : i32 to vector<8x8xi32>
      %40 = arith.addi %39, %38 : vector<8x8xi32>
      %c8_i32_15 = arith.constant 8 : i32
      %41 = arith.muli %arg1, %c8_i32_15 : i32
      %42 = tpu.iota {dimensions = array<i32: 1>} : vector<8x8xi32>
      %43 = vector.broadcast %41 : i32 to vector<8x8xi32>
      %44 = arith.addi %43, %42 : vector<8x8xi32>
      %c8_i32_16 = arith.constant 8 : i32
      %45 = vector.broadcast %c8_i32_16 : i32 to vector<8x8xi32>
      %46 = arith.cmpi sge, %40, %45 : vector<8x8xi32>
      %c8_i32_17 = arith.constant 8 : i32
      %47 = vector.broadcast %c8_i32_17 : i32 to vector<8x8xi32>
      %48 = arith.cmpi sge, %44, %47 : vector<8x8xi32>
      %49 = arith.ori %46, %48 : vector<8x8xi1>
      %50 = arith.cmpi eq, %40, %44 : vector<8x8xi32>
      %51 = arith.ori %49, %50 : vector<8x8xi1>
      %cst_18 = arith.constant -2.000000e+00 : f32
      %52 = vector.broadcast %cst_18 : f32 to vector<8x8xf32>
      %53 = arith.select %51, %52, %36 : vector<8x8xi1>, vector<8x8xf32>
      %c0_19 = arith.constant 0 : index
      %54 = memref.load %arg6[%c0_19] : memref<1xf32, #tpu.memory_space<smem>>
      %55 = vector.shape_cast %53 : vector<8x8xf32> to vector<1x8x8xf32>
      %cst_20 = arith.constant dense<0xFF800000> : vector<1xf32>
      %56 = vector.multi_reduction <maximumf>, %55, %cst_20 [1, 2] : vector<1x8x8xf32> to vector<1xf32>
      %57 = vector.shape_cast %56 : vector<1xf32> to vector<1x1x1xf32>
      %58 = vector.extract %57[0, 0, 0] : f32 from vector<1x1x1xf32>
      %59 = arith.maximumf %54, %58 : f32
      %c0_21 = arith.constant 0 : index
      %60 = memref.load %arg6[%c0_21] : memref<1xf32, #tpu.memory_space<smem>>
      memref.store %59, %arg6[%c0_21] : memref<1xf32, #tpu.memory_space<smem>>
    } else {
    }
    %c0_i32_3 = arith.constant 0 : i32
    %8 = arith.cmpi eq, %arg0, %c0_i32_3 : i32
    %c0_i32_4 = arith.constant 0 : i32
    %9 = arith.cmpi eq, %arg1, %c0_i32_4 : i32
    %10 = arith.andi %8, %9 : i1
    %11 = arith.extui %10 : i1 to i32
    %c0_i32_5 = arith.constant 0 : i32
    %12 = arith.cmpi ne, %11, %c0_i32_5 : i32
    scf.if %12 {
      %c0 = arith.constant 0 : index
      %13 = memref.load %arg6[%c0] : memref<1xf32, #tpu.memory_space<smem>>
      %cst = arith.constant -0.999989986 : f32
      %cst_6 = arith.constant 0.999989986 : f32
      %14 = arith.maximumf %cst, %13 : f32
      %15 = arith.minimumf %cst_6, %14 : f32
      %c0_7 = arith.constant 0 : index
      %c0_8 = arith.constant 0 : index
      %16 = memref.load %arg5[%c0_7, %c0_8] : memref<1x1xf32, #tpu.memory_space<smem>>
      memref.store %15, %arg5[%c0_7, %c0_8] : memref<1x1xf32, #tpu.memory_space<smem>>
    } else {
    }
    return
  }
  func.func @transform_0(%arg0: i32, %arg1: i32) -> (i32, i32) {
    %c0_i32 = arith.constant 0 : i32
    %c0_i32_0 = arith.constant 0 : i32
    %c0_i32_1 = arith.constant 0 : i32
    return %c0_i32, %c0_i32_0 : i32, i32
  }
  func.func @transform_1(%arg0: i32, %arg1: i32) -> (i32, i32) {
    %c0_i32 = arith.constant 0 : i32
    %c0_i32_0 = arith.constant 0 : i32
    return %arg0, %c0_i32 : i32, i32
  }
  func.func @transform_2(%arg0: i32, %arg1: i32) -> (i32, i32) {
    %c0_i32 = arith.constant 0 : i32
    %c0_i32_0 = arith.constant 0 : i32
    return %arg1, %c0_i32 : i32, i32
  }
  func.func @transform_3(%arg0: i32, %arg1: i32) -> (i32, i32) {
    %c0_i32 = arith.constant 0 : i32
    %c0_i32_0 = arith.constant 0 : i32
    %c0_i32_1 = arith.constant 0 : i32
    return %c0_i32, %c0_i32_0 : i32, i32
  }
}

</mosaic_0001>

<bundles_post_ra>
// kernel: tpu_custom_call.1
= control target key start
LH: loop header
LB: loop body
LE: loop exit
PB: predicated region body
PF: predicated region fallthrough
CT: control target
= control target key end

     0   :  { %8 = vsyncpa [#allocation4], 0  ;;  %s324_s0 = inlined_call_operand.hbm [shape: f32[1,128], index: 0, kind: input, shape index: {}]   ;;  %s325_s1 = inlined_call_operand.hbm [shape: f32[8,128], index: 1, kind: input, shape index: {}]   ;;  %s326_s2 = inlined_call_operand.hbm [shape: f32[8,128], index: 2, kind: input, shape index: {}]   ;;  %s327_s3 = inlined_call_operand.hbm [shape: f32[1,1], index: 3, kind: output, shape index: {}]  }
   0x1   :  { %9 = vsyncpa [#allocation7], 0  ;;  %s27_s14 = sshll.u32 %s325_s1, 4  ;;  %s28_s14 = int_to_ptr.hbm [resolvable:$true] %s27_s14 }
   0x2   :  { %10 = vsyncpa [#allocation5], 0  ;;  %s285_s15 = smov [#allocation6]   ;;  %s16_s19 = sshll.u32 %s324_s0, 4  ;;  %s17_s19 = int_to_ptr.hbm [resolvable:$true] %s16_s19 }
   0x3   :  { %s29_s16 = sshll.u32 %s285_s15, 4  ;;  %s286_s20 = smov [#allocation3]   ;;  %s30_s16 = int_to_ptr.vmem [resolvable:$true] %s29_s16 }
   0x4   :  { %32 = dma.hbm_to_vmem [thread:$0]  %s28_s14, 128, %s30_s16, [#allocation7]  }
   0x5   :  { %s18_s21 = sshll.u32 %s286_s20, 4  ;;  %s38_s24 = sshll.u32 %s326_s2, 4  ;;  %s19_s21 = int_to_ptr.vmem [resolvable:$true] %s18_s21  ;;  %s39_s24 = int_to_ptr.hbm [resolvable:$true] %s38_s24 }
   0x6   :  { %21 = dma.hbm_to_vmem [thread:$0]  %s17_s19, 16, %s19_s21, [#allocation4]  }
   0x7   :  { %s287_s1 = smov [#allocation8]  }
   0x8   :  { %s40_s25 = sshll.u32 %s287_s1, 4  ;;  %s41_s25 = int_to_ptr.vmem [resolvable:$true] %s40_s25 }
   0x9   :  { %43 = dma.hbm_to_vmem [thread:$0]  %s39_s24, 128, %s41_s25, [#allocation7]  }
   0xa   :  { %279 = dma.done.wait [#allocation4], 16  }
   0xb   :  { %280 = vsyncadd [#allocation4], 4294967280 }
   0xc   :  { %281 = dma.done.wait [#allocation7], 256  }
   0xd   :  { %282 = vsyncadd [#allocation7], 4294967040  ;;  %v190_v0 = vld [vmem:[#allocation3] ss:$0 sm:$0xff]  ;;  %v89_v1 = vld [vmem:[#allocation8] sm:$0xff]  ;;  %v127_v27 = vlaneseq  ;;  %vm143_vm9 = vcmask 64512  }
   0xe   :  { %v90_v2 = vsub.f32 %v89_v1, %v190_v0  ;;  %v69_v3 = vld [vmem:[#allocation6] sm:$0xff]  ;;  %s169_s26 = sshll.u32 %s327_s3, 4  ;;  %s288_s28 = smov -2.0   ;;  %s170_s26 = int_to_ptr.hbm [resolvable:$true] %s169_s26 }
   0xf   :  { %v73_v5 = vsub.f32 %v69_v3, %v190_v0  ;;  %v128_v28 = vshrl.u32 %v127_v27, 7  ;;  %v133_v29 = vand.u32 127, %v127_v27  ;;  %s289_s30 = smov -0.99999   ;;  %s290_s5 = smov 0.99999  }
  0x10   :  { %v91_v4 = vmul.f32 %v90_v2, %v90_v2  ;;  %s291_s7 = smov [#allocation9]  }
  0x11   :  { %v74_v6 = vmul.f32 %v73_v5, %v73_v5  ;;  %vm137_vm6 = vcmp.ge.s32.totalorder %v133_v29, 8  ;;  %vm139_vm7 = vcmp.eq.s32.totalorder %v128_v28, %v133_v29 }
  0x12   :  { %92 = vadd.xlane.f32.xlu0 %v91_v4  ;;  %vm140_vm8 = vmor %vm137_vm6, %vm139_vm7 }
  0x1a   :  { %75 = vadd.xlane.f32.xlu0 %v74_v6 }
  0x85   :  { %v93_v7 = vpop.xlane.xlu0 %92 }
  0x86   :  { %v94_v8 = vmax.f32 %v93_v7, 1e-24 }
  0x88   :  { %191 = vrsqrt.f32 %v94_v8  ;;  %vm101_vm1 = vweird.f32 %v94_v8 }
  0x8d   :  { %v76_v9 = vpop.xlane.xlu0 %75 }
  0x8e   :  { %v192_v10 = vpop.eup %191  ;;  %v77_v11 = vmax.f32 %v76_v9, 1e-24 }
  0x8f   :  { %v96_v12 = vmul.f32 %v192_v10, %v94_v8  ;;  %vm102_vm0 = vweird.f32 %v192_v10 }
  0x90   :  { %193 = vrsqrt.f32 %v77_v11  ;;  %vm103_vm2 = vmor %vm101_vm1, %vm102_vm0  ;;  %vm84_vm4 = vweird.f32 %v77_v11 }
  0x91   :  { %v97_v13 = vmul.f32 %v192_v10, %v96_v12 }
  0x93   :  { %v98_v14 = vmul.f32 0.5, %v97_v13 }
  0x95   :  { %v99_v15 = vsub.f32 1.5, %v98_v14 }
  0x96   :  { %v194_v16 = vpop.eup %193 }
  0x97   :  { %v79_v17 = vmul.f32 %v194_v16, %v77_v11  ;;  %v100_v18 = vmul.f32 %v192_v10, %v99_v15  ;;  %vm85_vm3 = vweird.f32 %v194_v16 }
  0x98   :  { %vm86_vm5 = vmor %vm84_vm4, %vm85_vm3 }
  0x99   :  { %v80_v19 = vmul.f32 %v194_v16, %v79_v17  ;;  %v104_v20 = vsel %vm103_vm2, %v192_v10, %v100_v18 }
  0x9a   :  { %v105_v21 = vmul.f32 %v104_v20, %v90_v2 }
  0x9b   :  { %v81_v22 = vmul.f32 0.5, %v80_v19 }
  0x9c   :  { %121 = vmatpush.xpose.msra.mxu0 %v105_v21 }
  0x9d   :  { %v82_v23 = vsub.f32 1.5, %v81_v22 }
  0x9f   :  { %v83_v24 = vmul.f32 %v194_v16, %v82_v23 }
  0xa1   :  { %v87_v25 = vsel %vm86_vm5, %v194_v16, %v83_v24 }
  0xa2   :  { %v88_v26 = vmul.f32 %v87_v25, %v73_v5 }
  0xa4   :  { %122 = vmatmul.f32.vlgmr.msra.gmra.mxu0 %v88_v26 }
 0x121   :  { %v123_v30 = vpop.f32.mrf.mxu0 }
 0x122   :  { %v141_v31 = vsel %vm140_vm8, -2.0, %v123_v30 }
 0x123   :  { %v144_v32 = vsel %vm143_vm9, %v141_v31, -inf }
 0x124   :  { %145 = vmax.xlane.f32.xlu1 %v144_v32 }
 0x197   :  { %v146_v33 = vpop.xlane.xlu1 %145 }
 0x198   :  { %v147_v34 = vrot.slane %v146_v33, 4 }
 0x19a   :  { %v148_v35 = vmax.f32 %v146_v33, %v147_v34 }
 0x19c   :  { %v149_v36 = vrot.slane %v148_v35, 2 }
 0x19e   :  { %v150_v37 = vmax.f32 %v148_v35, %v149_v36 }
 0x1a0   :  { %v151_v38 = vrot.slane %v150_v37, 1 }
 0x1a2   :  { %v152_v39 = vmax.f32 %v150_v37, %v151_v38 }
 0x1a4   :  { %181 = vpush %v152_v39 }
 0x1d5   :  { %s182_s27 = spop %181 }
 0x1d6   :  { %s154_s29 = smax.f32 %s288_s28, %s182_s27 }
 0x1d7   :  { %s160_s4 = smax.f32 %s289_s30, %s154_s29 }
 0x1d8   :  { %s161_s6 = smin.f32 %s290_s5, %s160_s4 }
 0x1d9   :  { %163 = sst [smem:[#allocation9]] %s161_s6 }
 0x1da   :  { %172 = dma.smem_to_hbm %s291_s7, 16, %s170_s26, [#allocation5]  }
 0x1db   :  { %283 = dma.done.wait [#allocation5], 16  }
 0x1dc   :  { %284 = vsyncadd [#allocation5], 4294967280 }
 0x1dd   :  { %177 = sfence }
 0x1de   :  { %178 = vsyncpa [#allocation4], 1 }
 0x1df   :  { %179 = vsyncpa [#allocation7], 1 }
 0x1e0   :  { %180 = vsyncpa [#allocation5], 1 }

</bundles_post_ra>
